<compile_context>
chip_gen: v6e
topology: v6e:2x2x1
jax: 0.10.0
libtpu: 0.0.40
codegen_flags: <defaults>
</compile_context>

<pallas_src>
import jax
import jax.numpy as jnp
from jax import lax
from jax.experimental import pallas as pl
from jax.experimental.pallas import tpu as pltpu

INPUT_SIZE = 42
HIDDEN_SIZE = 50
OUTPUT_SIZE = 12

HID_PAD = 64          # hidden padded to a multiple of 16 (bf16 sublane packing)
TB_MAX = 4096         # max batch tile (lane axis of the intermediates)


def _round_up(n, m):
    return ((n + m - 1) // m) * m


def _cdiv(a, b):
    return (a + b - 1) // b


def _mlp_kernel(x_ref,
                w1_ref, b1_ref,
                w2_ref, b2_ref,
                w3_ref, b3_ref,
                w4_ref, b4_ref,
                o_ref):
    # x_ref : [tb, INPUT_SIZE] f32  (natural layout; no wrapper transpose).
    # wN_ref: [out, in] bf16, bN_ref: [out, 1] f32 (VMEM-resident across steps).
    # Intermediates carry the batch on the 128-wide lane axis: [feat, tb].
    x = x_ref[...].astype(jnp.bfloat16)                        # [tb, IN]

    # fc1 + relu:  W1 @ x^T  via NT matmul (contract last dims of both operands).
    nt_dims = (((1,), (1,)), ((), ()))
    h = lax.dot_general(w1_ref[...], x, nt_dims,
                        preferred_element_type=jnp.float32) + b1_ref[...]
    h = jnp.maximum(h, 0.0)                                    # [HID_PAD, tb]

    # fc2 + relu
    h = jnp.dot(w2_ref[...], h.astype(jnp.bfloat16),
                preferred_element_type=jnp.float32) + b2_ref[...]
    h = jnp.maximum(h, 0.0)

    # fc3 + relu
    h = jnp.dot(w3_ref[...], h.astype(jnp.bfloat16),
                preferred_element_type=jnp.float32) + b3_ref[...]
    h = jnp.maximum(h, 0.0)

    # fc4 + sigmoid (lane-dense [OUT, tb] store; f32 for accuracy downstream).
    y = jnp.dot(w4_ref[...], h.astype(jnp.bfloat16),
                preferred_element_type=jnp.float32) + b4_ref[...]
    o_ref[...] = jax.nn.sigmoid(y).astype(o_ref.dtype)


def _prep_params(params):
    """Pad hidden dims to HID_PAD, transpose to [out, in], cast weights to bf16.

    Zero padding is mathematically inert: padded hidden rows get zero weight
    rows + zero bias (stay 0 through ReLU) and multiply zero weight columns in
    the next layer.  Input (42) and output (12) dims are NOT padded.
    """
    dims = [(INPUT_SIZE, HIDDEN_SIZE, INPUT_SIZE, HID_PAD),
            (HIDDEN_SIZE, HIDDEN_SIZE, HID_PAD, HID_PAD),
            (HIDDEN_SIZE, HIDDEN_SIZE, HID_PAD, HID_PAD),
            (HIDDEN_SIZE, OUTPUT_SIZE, HID_PAD, OUTPUT_SIZE)]
    prepped = []
    for i, (fi, fo, fip, fop) in enumerate(dims, start=1):
        w = params[f"w{i}"]                                                    # [fi, fo]
        b = params[f"b{i}"]                                                    # [1, fo]
        wp = jnp.pad(w, ((0, fip - fi), (0, fop - fo))).T.astype(jnp.bfloat16)  # [fop, fip]
        bp = jnp.pad(b, ((0, 0), (0, fop - fo))).T.astype(jnp.float32)          # [fop, 1]
        prepped += [wp, bp]
    return prepped


def _pick_tb(B):
    if B <= 128:
        return _round_up(max(B, 1), 8)                       # single small tile
    # >= 2 tiles so the "parallel" batch axis can use both TCs on v7x,
    # capped at TB_MAX to bound VMEM.
    return min(TB_MAX, _round_up(_cdiv(B, 2), 128))


def transformation_model_forward(x, params, tb=None):
    """x: [B, INPUT_SIZE] float. params: dict with w{i}: [in, out], b{i}: [1, out].

    Returns [B, OUTPUT_SIZE] float32.
    """
    B = x.shape[0]
    if tb is None:
        tb = _pick_tb(B)
    n_tiles = _cdiv(B, tb)
    B_pad = n_tiles * tb

    x = x.astype(jnp.float32)
    if B_pad != B:                      # batch pad only (no feature pad / transpose)
        x = jnp.pad(x, ((0, B_pad - B), (0, 0)))

    w1, b1, w2, b2, w3, b3, w4, b4 = _prep_params(params)

    def resident(a):                    # constant index_map -> stays in VMEM
        return pl.BlockSpec(a.shape, lambda i: (0, 0))

    flops = 2 * B_pad * (INPUT_SIZE * HID_PAD + 2 * HID_PAD * HID_PAD
                         + HID_PAD * OUTPUT_SIZE)
    weight_bytes = sum(int(a.size) * a.dtype.itemsize
                       for a in (w1, b1, w2, b2, w3, b3, w4, b4))
    bytes_accessed = (B_pad * INPUT_SIZE * 4          # x read (f32, cast in-kernel)
                      + B_pad * OUTPUT_SIZE * 4       # output write (f32)
                      + weight_bytes)

    out_t = pl.pallas_call(
        _mlp_kernel,
        out_shape=jax.ShapeDtypeStruct((OUTPUT_SIZE, B_pad), jnp.float32),
        grid=(n_tiles,),
        in_specs=[
            pl.BlockSpec((tb, INPUT_SIZE), lambda i: (i, 0)),   # x streamed over batch
            resident(w1), resident(b1),
            resident(w2), resident(b2),
            resident(w3), resident(b3),
            resident(w4), resident(b4),
        ],
        out_specs=pl.BlockSpec((OUTPUT_SIZE, tb), lambda i: (0, i)),  # lane-dense
        compiler_params=pltpu.CompilerParams(
            dimension_semantics=("parallel",),
            vmem_limit_bytes=32 * 1024 * 1024),
        cost_estimate=pl.CostEstimate(
            flops=int(flops),
            transcendentals=int(B_pad * OUTPUT_SIZE),
            bytes_accessed=int(bytes_accessed)),
    )(x, w1, b1, w2, b2, w3, b3, w4, b4)

    # Only the tiny [12, B] result is transposed back; x was never transposed.
    return out_t[:, :B].T


def init_params(key):
    """nn.Linear-style init: U(-1/sqrt(fan_in), 1/sqrt(fan_in)).
    Weights stored as [in, out] so the reference computes x @ W + b."""
    dims = [(INPUT_SIZE, HIDDEN_SIZE),
            (HIDDEN_SIZE, HIDDEN_SIZE),
            (HIDDEN_SIZE, HIDDEN_SIZE),
            (HIDDEN_SIZE, OUTPUT_SIZE)]
    params = {}
    for i, (fan_in, fan_out) in enumerate(dims, start=1):
        key, kw, kb = jax.random.split(key, 3)
        bound = 1.0 / jnp.sqrt(jnp.float32(fan_in))
        params[f"w{i}"] = jax.random.uniform(
            kw, (fan_in, fan_out), jnp.float32, minval=-bound, maxval=bound)
        params[f"b{i}"] = jax.random.uniform(
            kb, (1, fan_out), jnp.float32, minval=-bound, maxval=bound)
    return params


def reference_forward(x, p):
    h = jax.nn.relu(x @ p["w1"] + p["b1"])
    h = jax.nn.relu(h @ p["w2"] + p["b2"])
    h = jax.nn.relu(h @ p["w3"] + p["b3"])
    return jax.nn.sigmoid(h @ p["w4"] + p["b4"])


# TODO(synk): mutation() / from_crossover() are host-side genetic-algorithm ops
# (random per-parameter perturbation), not part of the forward pass; not ported.

if __name__ == "__main__":
    key = jax.random.PRNGKey(0)
    key, kx = jax.random.split(key)
    B = 8
    x = jax.random.normal(kx, (B, INPUT_SIZE), jnp.float32)
    params = init_params(key)

    out = transformation_model_forward(x, params)
    out = jax.block_until_ready(out)

    ref = reference_forward(x, params)
    assert out.shape == (B, OUTPUT_SIZE)
    # bf16 MXU operands with f32 accumulation -> small numerical drift vs f32 reference.
    assert jnp.allclose(out, ref, atol=2e-2, rtol=2e-2), "mismatch vs reference"
    print("KERNEL_OK")
</pallas_src>

<mosaic_0001>
module attributes {stable_mosaic.version = 11 : i64} {
  func.func @_mlp_kernel(%arg0: i32, %arg1: memref<8x42xf32, #tpu.memory_space<vmem>>, %arg2: memref<64x42xbf16, #tpu.memory_space<vmem>>, %arg3: memref<64x1xf32, #tpu.memory_space<vmem>>, %arg4: memref<64x64xbf16, #tpu.memory_space<vmem>>, %arg5: memref<64x1xf32, #tpu.memory_space<vmem>>, %arg6: memref<64x64xbf16, #tpu.memory_space<vmem>>, %arg7: memref<64x1xf32, #tpu.memory_space<vmem>>, %arg8: memref<12x64xbf16, #tpu.memory_space<vmem>>, %arg9: memref<12x1xf32, #tpu.memory_space<vmem>>, %arg10: memref<12x8xf32, #tpu.memory_space<vmem>>) attributes {dimension_semantics = [#tpu.dimension_semantics<parallel>], iteration_bounds = array<i64: 1>, scalar_prefetch = 0 : i64, scratch_operands = 0 : i64, tpu.core_type = #tpu.core_type<tc>, window_params = [{transform_indices = @transform_0, window_bounds = array<i64: 8, 42>}, {pipeline_mode = #tpu.pipeline_mode<synchronous>, transform_indices = @transform_1, window_bounds = array<i64: 64, 42>}, {pipeline_mode = #tpu.pipeline_mode<synchronous>, transform_indices = @transform_2, window_bounds = array<i64: 64, 1>}, {pipeline_mode = #tpu.pipeline_mode<synchronous>, transform_indices = @transform_3, window_bounds = array<i64: 64, 64>}, {pipeline_mode = #tpu.pipeline_mode<synchronous>, transform_indices = @transform_4, window_bounds = array<i64: 64, 1>}, {pipeline_mode = #tpu.pipeline_mode<synchronous>, transform_indices = @transform_5, window_bounds = array<i64: 64, 64>}, {pipeline_mode = #tpu.pipeline_mode<synchronous>, transform_indices = @transform_6, window_bounds = array<i64: 64, 1>}, {pipeline_mode = #tpu.pipeline_mode<synchronous>, transform_indices = @transform_7, window_bounds = array<i64: 12, 64>}, {pipeline_mode = #tpu.pipeline_mode<synchronous>, transform_indices = @transform_8, window_bounds = array<i64: 12, 1>}, {transform_indices = @transform_9, window_bounds = array<i64: 12, 8>}]} {
    %c0 = arith.constant 0 : index
    %c0_0 = arith.constant 0 : index
    %0 = vector.load %arg1[%c0, %c0_0] : memref<8x42xf32, #tpu.memory_space<vmem>>, vector<8x42xf32>
    %1 = arith.truncf %0 : vector<8x42xf32> to vector<8x42xbf16>
    %c0_1 = arith.constant 0 : index
    %c0_2 = arith.constant 0 : index
    %2 = vector.load %arg2[%c0_1, %c0_2] : memref<64x42xbf16, #tpu.memory_space<vmem>>, vector<64x42xbf16>
    %cst = arith.constant dense<0.000000e+00> : vector<64x8xf32>
    %3 = tpu.matmul %2, %1, %cst {dimension_numbers = #tpu.dot_dimension_numbers<[1], [1], [0], [0], [0, 0, 1, 0], [], []>} : vector<64x42xbf16>, vector<8x42xbf16>, vector<64x8xf32> -> vector<64x8xf32>
    %c0_3 = arith.constant 0 : index
    %c0_4 = arith.constant 0 : index
    %4 = vector.load %arg3[%c0_3, %c0_4] : memref<64x1xf32, #tpu.memory_space<vmem>>, vector<64x1xf32>
    %5 = vector.broadcast %4 : vector<64x1xf32> to vector<64x8xf32>
    %6 = arith.addf %3, %5 : vector<64x8xf32>
    %cst_5 = arith.constant 0.000000e+00 : f32
    %7 = vector.broadcast %cst_5 : f32 to vector<64x8xf32>
    %8 = arith.maximumf %6, %7 : vector<64x8xf32>
    %c0_6 = arith.constant 0 : index
    %c0_7 = arith.constant 0 : index
    %9 = vector.load %arg4[%c0_6, %c0_7] : memref<64x64xbf16, #tpu.memory_space<vmem>>, vector<64x64xbf16>
    %10 = arith.truncf %8 : vector<64x8xf32> to vector<64x8xbf16>
    %cst_8 = arith.constant dense<0.000000e+00> : vector<64x8xf32>
    %11 = tpu.matmul %9, %10, %cst_8 {dimension_numbers = #tpu.dot_dimension_numbers<[1], [0], [0], [1], [0, 0, 1, 1], [], []>} : vector<64x64xbf16>, vector<64x8xbf16>, vector<64x8xf32> -> vector<64x8xf32>
    %c0_9 = arith.constant 0 : index
    %c0_10 = arith.constant 0 : index
    %12 = vector.load %arg5[%c0_9, %c0_10] : memref<64x1xf32, #tpu.memory_space<vmem>>, vector<64x1xf32>
    %13 = vector.broadcast %12 : vector<64x1xf32> to vector<64x8xf32>
    %14 = arith.addf %11, %13 : vector<64x8xf32>
    %cst_11 = arith.constant 0.000000e+00 : f32
    %15 = vector.broadcast %cst_11 : f32 to vector<64x8xf32>
    %16 = arith.maximumf %14, %15 : vector<64x8xf32>
    %c0_12 = arith.constant 0 : index
    %c0_13 = arith.constant 0 : index
    %17 = vector.load %arg6[%c0_12, %c0_13] : memref<64x64xbf16, #tpu.memory_space<vmem>>, vector<64x64xbf16>
    %18 = arith.truncf %16 : vector<64x8xf32> to vector<64x8xbf16>
    %cst_14 = arith.constant dense<0.000000e+00> : vector<64x8xf32>
    %19 = tpu.matmul %17, %18, %cst_14 {dimension_numbers = #tpu.dot_dimension_numbers<[1], [0], [0], [1], [0, 0, 1, 1], [], []>} : vector<64x64xbf16>, vector<64x8xbf16>, vector<64x8xf32> -> vector<64x8xf32>
    %c0_15 = arith.constant 0 : index
    %c0_16 = arith.constant 0 : index
    %20 = vector.load %arg7[%c0_15, %c0_16] : memref<64x1xf32, #tpu.memory_space<vmem>>, vector<64x1xf32>
    %21 = vector.broadcast %20 : vector<64x1xf32> to vector<64x8xf32>
    %22 = arith.addf %19, %21 : vector<64x8xf32>
    %cst_17 = arith.constant 0.000000e+00 : f32
    %23 = vector.broadcast %cst_17 : f32 to vector<64x8xf32>
    %24 = arith.maximumf %22, %23 : vector<64x8xf32>
    %c0_18 = arith.constant 0 : index
    %c0_19 = arith.constant 0 : index
    %25 = vector.load %arg8[%c0_18, %c0_19] : memref<12x64xbf16, #tpu.memory_space<vmem>>, vector<12x64xbf16>
    %26 = arith.truncf %24 : vector<64x8xf32> to vector<64x8xbf16>
    %cst_20 = arith.constant dense<0.000000e+00> : vector<12x8xf32>
    %27 = tpu.matmul %25, %26, %cst_20 {dimension_numbers = #tpu.dot_dimension_numbers<[1], [0], [0], [1], [0, 0, 1, 1], [], []>} : vector<12x64xbf16>, vector<64x8xbf16>, vector<12x8xf32> -> vector<12x8xf32>
    %c0_21 = arith.constant 0 : index
    %c0_22 = arith.constant 0 : index
    %28 = vector.load %arg9[%c0_21, %c0_22] : memref<12x1xf32, #tpu.memory_space<vmem>>, vector<12x1xf32>
    %29 = vector.broadcast %28 : vector<12x1xf32> to vector<12x8xf32>
    %30 = arith.addf %27, %29 : vector<12x8xf32>
    %31 = arith.negf %30 : vector<12x8xf32>
    %32 = math.exp %31 : vector<12x8xf32>
    %cst_23 = arith.constant 1.000000e+00 : f32
    %33 = vector.broadcast %cst_23 : f32 to vector<12x8xf32>
    %34 = arith.addf %33, %32 : vector<12x8xf32>
    %35 = arith.divf %33, %34 : vector<12x8xf32>
    %c0_24 = arith.constant 0 : index
    %c0_25 = arith.constant 0 : index
    %36 = vector.load %arg10[%c0_24, %c0_25] : memref<12x8xf32, #tpu.memory_space<vmem>>, vector<12x8xf32>
    tpu.vector_store %arg10[%c0_24, %c0_25], %35 {strides = array<i32>} : memref<12x8xf32, #tpu.memory_space<vmem>>, vector<12x8xf32>,
    return
  }
  func.func @transform_0(%arg0: i32) -> (i32, i32) {
    %c0_i32 = arith.constant 0 : i32
    %c0_i32_0 = arith.constant 0 : i32
    return %arg0, %c0_i32 : i32, i32
  }
  func.func @transform_1(%arg0: i32) -> (i32, i32) {
    %c0_i32 = arith.constant 0 : i32
    %c0_i32_0 = arith.constant 0 : i32
    %c0_i32_1 = arith.constant 0 : i32
    return %c0_i32, %c0_i32_0 : i32, i32
  }
  func.func @transform_2(%arg0: i32) -> (i32, i32) {
    %c0_i32 = arith.constant 0 : i32
    %c0_i32_0 = arith.constant 0 : i32
    %c0_i32_1 = arith.constant 0 : i32
    return %c0_i32, %c0_i32_0 : i32, i32
  }
  func.func @transform_3(%arg0: i32) -> (i32, i32) {
    %c0_i32 = arith.constant 0 : i32
    %c0_i32_0 = arith.constant 0 : i32
    %c0_i32_1 = arith.constant 0 : i32
    return %c0_i32, %c0_i32_0 : i32, i32
  }
  func.func @transform_4(%arg0: i32) -> (i32, i32) {
    %c0_i32 = arith.constant 0 : i32
    %c0_i32_0 = arith.constant 0 : i32
    %c0_i32_1 = arith.constant 0 : i32
    return %c0_i32, %c0_i32_0 : i32, i32
  }
  func.func @transform_5(%arg0: i32) -> (i32, i32) {
    %c0_i32 = arith.constant 0 : i32
    %c0_i32_0 = arith.constant 0 : i32
    %c0_i32_1 = arith.constant 0 : i32
    return %c0_i32, %c0_i32_0 : i32, i32
  }
  func.func @transform_6(%arg0: i32) -> (i32, i32) {
    %c0_i32 = arith.constant 0 : i32
    %c0_i32_0 = arith.constant 0 : i32
    %c0_i32_1 = arith.constant 0 : i32
    return %c0_i32, %c0_i32_0 : i32, i32
  }
  func.func @transform_7(%arg0: i32) -> (i32, i32) {
    %c0_i32 = arith.constant 0 : i32
    %c0_i32_0 = arith.constant 0 : i32
    %c0_i32_1 = arith.constant 0 : i32
    return %c0_i32, %c0_i32_0 : i32, i32
  }
  func.func @transform_8(%arg0: i32) -> (i32, i32) {
    %c0_i32 = arith.constant 0 : i32
    %c0_i32_0 = arith.constant 0 : i32
    %c0_i32_1 = arith.constant 0 : i32
    return %c0_i32, %c0_i32_0 : i32, i32
  }
  func.func @transform_9(%arg0: i32) -> (i32, i32) {
    %c0_i32 = arith.constant 0 : i32
    %c0_i32_0 = arith.constant 0 : i32
    return %c0_i32, %arg0 : i32, i32
  }
}

</mosaic_0001>

<bundles_post_ra>
// kernel: tpu_custom_call.1
= control target key start
LH: loop header
LB: loop body
LE: loop exit
PB: predicated region body
PF: predicated region fallthrough
CT: control target
= control target key end

     0   :  { %vm111_vm0 = vcmask 343040   ;;  %v753_v1 = vmov 0   ;;  %vm280_vm1 = vcmask 523264   ;;  %vm755_vm2 = vmmov 0   ;;  %s947_s0 = inlined_call_operand.vmem [shape: f32[8,42], index: 0, kind: input, shape index: {}]   ;;  %s948_s1 = inlined_call_operand.vmem [shape: bf16[64,42], index: 1, kind: input, shape index: {}]   ;;  %s949_s2 = inlined_call_operand.vmem [shape: f32[64,1], index: 2, kind: input, shape index: {}]   ;;  %s950_s4 = inlined_call_operand.vmem [shape: f32[64,1], index: 4, kind: input, shape index: {}]   ;;  %s951_s6 = inlined_call_operand.vmem [shape: f32[64,1], index: 6, kind: input, shape index: {}]   ;;  %s952_s8 = inlined_call_operand.vmem [shape: f32[12,1], index: 8, kind: input, shape index: {}]   ;;  %s953_s3 = inlined_call_operand.vmem [shape: bf16[64,64], index: 3, kind: input, shape index: {}]   ;;  %s954_s5 = inlined_call_operand.vmem [shape: bf16[64,64], index: 5, kind: input, shape index: {}]   ;;  %s955_s7 = inlined_call_operand.vmem [shape: bf16[12,64], index: 7, kind: input, shape index: {}]   ;;  %s956_s9 = inlined_call_operand.vmem [shape: f32[12,8], index: 9, kind: output, shape index: {}]  }
   0x1   :  { %v33_v0 = vld [vmem:[%s947_s0] sm:$0xff]  ;;  %730 = vset.pattern.permute.xlu0 %v753_v1  ;;  %731 = vset.pattern.permute.xlu1 %v753_v1  ;;  %v49_v5 = vld [vmem:[%s949_s2 + $0x30] sm:$0xff]  ;;  %v50_v7 = vld [vmem:[%s949_s2 + $0x38] sm:$0xff]  ;;  %vm610_vm3 = vcmask 64512   ;;  %vm612_vm4 = vcmask 60416  }
   0x2   :  { %v34_v2 = vpack.c.bf16 %v33_v0, %v33_v0  ;;  %v732_v3 = vld [vmem:[%s948_s1] sm:$0xff]   ;;  %83 = vperm.xlu0 %730, %v49_v5   ;;  %v733_v8 = vld [vmem:[%s948_s1 + $0x8] sm:$0xff]   ;;  %v734_v10 = vld [vmem:[%s948_s1 + $0x10] sm:$0xff]  }
   0x3   :  { %674 = vmatprep.mubr.msk.bf16.mxu0 %vm111_vm0, %v732_v3  ;;  %v47_v6 = vld [vmem:[%s949_s2 + $0x20] sm:$0xff]  ;;  %v48_v9 = vld [vmem:[%s949_s2 + $0x28] sm:$0xff]  ;;  %v45_v11 = vld [vmem:[%s949_s2 + $0x10] sm:$0xff] }
   0x4   :  { %726 = vmatprep.subr.msk.bf16.mxu0 %vm111_vm0, %v34_v2  ;;  %v125_v4 = vsel %vm111_vm0, %v34_v2, 0  ;;  %73 = vperm.xlu1 %731, %v47_v6   ;;  %v46_v12 = vld [vmem:[%s949_s2 + $0x18] sm:$0xff]  ;;  %v43_v13 = vld [vmem:[%s949_s2] sm:$0xff]  ;;  %v44_v15 = vld [vmem:[%s949_s2 + $0x8] sm:$0xff] }
   0x5   :  { %673 = vmatpush3.bf16.xpose.msra.mxu0 %v125_v4  ;;  %v735_v14 = vld [vmem:[%s948_s1 + $0x18] sm:$0xff]   ;;  %v218_v16 = vld [vmem:[%s950_s4 + $0x30] sm:$0xff]  ;;  %v216_v18 = vld [vmem:[%s950_s4 + $0x20] sm:$0xff] }
   0x6   :  { %88 = vperm.xlu0 %730, %v50_v7   ;;  %v219_v17 = vld [vmem:[%s950_s4 + $0x38] sm:$0xff]  ;;  %v217_v19 = vld [vmem:[%s950_s4 + $0x28] sm:$0xff]  ;;  %v214_v20 = vld [vmem:[%s950_s4 + $0x10] sm:$0xff] }
   0x7   :  { %v215_v21 = vld [vmem:[%s950_s4 + $0x18] sm:$0xff]  ;;  %v212_v22 = vld [vmem:[%s950_s4] sm:$0xff]  ;;  %v213_v23 = vld [vmem:[%s950_s4 + $0x8] sm:$0xff] }
   0x8   :  { %78 = vperm.xlu1 %731, %v48_v9   ;;  %v384_v24 = vld [vmem:[%s951_s6 + $0x30] sm:$0xff]  ;;  %v385_v25 = vld [vmem:[%s951_s6 + $0x38] sm:$0xff]  ;;  %v382_v26 = vld [vmem:[%s951_s6 + $0x20] sm:$0xff] }
   0x9   :  { %v383_v27 = vld [vmem:[%s951_s6 + $0x28] sm:$0xff]  ;;  %v380_v28 = vld [vmem:[%s951_s6 + $0x10] sm:$0xff]  ;;  %v381_v29 = vld [vmem:[%s951_s6 + $0x18] sm:$0xff] }
   0xa   :  { %63 = vperm.xlu0 %730, %v45_v11   ;;  %v378_v30 = vld [vmem:[%s951_s6] sm:$0xff]  ;;  %v379_v31 = vld [vmem:[%s951_s6 + $0x8] sm:$0xff]  ;;  %v739_v9 = vld [vmem:[%s953_s3 + $0x18] sm:$0xff]  }
   0xb   :  { %v537_v32 = vld [vmem:[%s952_s8] sm:$0xff]  ;;  %v538_v33 = vld [vmem:[%s952_s8 + $0x8] sm:$0xf] }
   0xc   :  { %675 = vmatmul.mubr.msk.bf16.vlgmr.msra.gmra.mxu0 %vm111_vm0, %v733_v8  ;;  %68 = vperm.xlu1 %731, %v46_v12   ;;  %v736_v34 = vld [vmem:[%s953_s3] sm:$0xff]   ;;  %v737_v7 = vld [vmem:[%s953_s3 + $0x8] sm:$0xff]   ;;  %v738_v8 = vld [vmem:[%s953_s3 + $0x10] sm:$0xff]  }
   0xd   :  { %678 = vmatprep.mubr.msk.bf16.mxu0 %vm111_vm0, %v734_v10  ;;  %690 = vmatprep.mubr.msk.bf16.mxu1 %vm280_vm1, %v736_v34  ;;  %v740_v10 = vld [vmem:[%s954_s5] sm:$0xff]  }
   0xe   :  { %53 = vperm.xlu0 %730, %v43_v13  }
  0x10   :  { %58 = vperm.xlu1 %731, %v44_v15  }
  0x12   :  { %252 = vperm.xlu0 %730, %v218_v16  }
  0x14   :  { %679 = vmatmul.mubr.msk.bf16.gmra.mxu0 %vm111_vm0, %v735_v14  ;;  %257 = vperm.xlu1 %731, %v219_v17  }
  0x15   :  { %706 = vmatprep.mubr.msk.bf16.mxu0 %vm280_vm1, %v740_v10 }
  0x16   :  { %242 = vperm.xlu0 %730, %v216_v18  }
  0x18   :  { %247 = vperm.xlu1 %731, %v217_v19  }
  0x1a   :  { %232 = vperm.xlu0 %730, %v214_v20  }
  0x1c   :  { %237 = vperm.xlu1 %731, %v215_v21  }
  0x1e   :  { %222 = vperm.xlu0 %730, %v212_v22  }
  0x20   :  { %227 = vperm.xlu1 %731, %v213_v23  }
  0x22   :  { %418 = vperm.xlu0 %730, %v384_v24  }
  0x24   :  { %423 = vperm.xlu1 %731, %v385_v25  }
  0x26   :  { %408 = vperm.xlu0 %730, %v382_v26  }
  0x28   :  { %413 = vperm.xlu1 %731, %v383_v27  }
  0x2a   :  { %398 = vperm.xlu0 %730, %v380_v28  }
  0x2c   :  { %403 = vperm.xlu1 %731, %v381_v29  }
  0x2e   :  { %388 = vperm.xlu0 %730, %v378_v30  }
  0x30   :  { %393 = vperm.xlu1 %731, %v379_v31  }
  0x32   :  { %541 = vperm.xlu0 %730, %v537_v32  }
  0x34   :  { %546 = vperm.xlu1 %731, %v538_v33  }
  0x7d   :  { %v84_v37 = vpop.permute.xlu0 %83 }
  0x7f   :  { %v74_v35 = vpop.permute.xlu1 %73 }
  0x81   :  { %v89_v42 = vpop.permute.xlu0 %88 }
  0x83   :  { %v79_v40 = vpop.permute.xlu1 %78 }
  0x85   :  { %v64_v50 = vpop.permute.xlu0 %63 }
  0x87   :  { %v69_v46 = vpop.permute.xlu1 %68 }
  0x89   :  { %v54_v0 = vpop.permute.xlu0 %53 }
  0x8b   :  { %v59_v60 = vpop.permute.xlu1 %58 }
  0x8d   :  { %v253_v13 = vpop.permute.xlu0 %252 }
  0x8f   :  { %v258_v11 = vpop.permute.xlu1 %257 }
  0x91   :  { %v243_v18 = vpop.permute.xlu0 %242 }
  0x93   :  { %v248_v16 = vpop.permute.xlu1 %247 }
  0x95   :  { %v233_v26 = vpop.permute.xlu0 %232 }
  0x97   :  { %v238_v22 = vpop.permute.xlu1 %237 }
  0xcc   :  { %v676_v36 = vpop.f32.mrf.mxu0 }
  0xcd   :  { %v170_v56 = vadd.f32 %v676_v36, %v64_v50  ;;  %v228_v36 = vpop.permute.xlu1 %227  ;;  %v754_v50 = vmov 0.0  }
  0xce   :  { %v161_v38 = vpop.f32.mrf.mxu0 }
  0xcf   :  { %v194_v1 = vmax.f32 %v170_v56, 0.0  ;;  %v162_v2 = vadd.f32 %v161_v38, %v54_v0 }
  0xd0   :  { %v677_v39 = vpop.f32.mrf.mxu0 }
  0xd1   :  { %v173_v52 = vadd.f32 %v677_v39, %v69_v46  ;;  %v192_v5 = vmax.f32 %v162_v2, 0.0 }
  0xd2   :  { %v164_v41 = vpop.f32.mrf.mxu0 }
  0xd3   :  { %v195_v61 = vmax.f32 %v173_v52, 0.0  ;;  %v165_v62 = vadd.f32 %v164_v41, %v59_v60  ;;  %v424_v52 = vpop.permute.xlu1 %423 }
  0xd4   :  { %v680_v43 = vpop.f32.mrf.mxu0 }
  0xd5   :  { %v186_v45 = vadd.f32 %v680_v43, %v84_v37  ;;  %v209_v3 = vpack.c.bf16 %v195_v61, %v194_v1  ;;  %v193_v4 = vmax.f32 %v165_v62, 0.0 }
  0xd6   :  { %v177_v44 = vpop.f32.mrf.mxu0 }
  0xd7   :  { %v178_v48 = vadd.f32 %v177_v44, %v74_v35  ;;  %v198_v53 = vmax.f32 %v186_v45, 0.0  ;;  %v208_v6 = vpack.c.bf16 %v193_v4, %v192_v5 }
  0xd8   :  { %v681_v47 = vpop.f32.mrf.mxu0 }
  0xd9   :  { %v189_v49 = vadd.f32 %v681_v47, %v89_v42  ;;  %v196_v57 = vmax.f32 %v178_v48, 0.0  ;;  %v741_v47 = vld [vmem:[%s954_s5 + $0x8] sm:$0xff]   ;;  %v742_v48 = vld [vmem:[%s954_s5 + $0x10] sm:$0xff]  }
  0xda   :  { %v180_v51 = vpop.f32.mrf.mxu0 }
  0xdb   :  { %v199_v54 = vmax.f32 %v189_v49, 0.0  ;;  %v181_v55 = vadd.f32 %v180_v51, %v79_v40  ;;  %v223_v40 = vpop.permute.xlu0 %222  ;;  %v743_v49 = vld [vmem:[%s954_s5 + $0x18] sm:$0xff]  }
  0xdd   :  { %v197_v58 = vmax.f32 %v181_v55, 0.0  ;;  %v211_v59 = vpack.c.bf16 %v199_v54, %v198_v53 }
  0xdf   :  { %v210_v63 = vpack.c.bf16 %v197_v58, %v196_v57  ;;  %682 = vmatprep.subr.bf16.mxu1 %v211_v59  ;;  %v419_v54 = vpop.permute.xlu0 %418  ;;  %v414_v57 = vpop.permute.xlu1 %413 }
  0xe0   :  { %683 = vmatpush3.bf16.msra.mxu1 %v211_v59 }
  0xe1   :  { %684 = vmatprep.subr.bf16.mxu1 %v210_v63 }
  0xe3   :  { %v409_v59 = vpop.permute.xlu0 %408  ;;  %v404_v0 = vpop.permute.xlu1 %403 }
  0xe4   :  { %685 = vmatpush3.bf16.msra.mxu1 %v210_v63 }
  0xe5   :  { %686 = vmatprep.subr.bf16.mxu1 %v209_v3 }
  0xe8   :  { %687 = vmatpush3.bf16.msra.mxu1 %v209_v3 }
  0xe9   :  { %688 = vmatprep.subr.bf16.mxu1 %v208_v6 }
  0xec   :  { %689 = vmatpush3.bf16.msra.mxu1 %v208_v6  ;;  %v399_v6 = vpop.permute.xlu0 %398 }
  0xed   :  { %714 = vmatprep.subr.bf16.mxu1 %v754_v50 }
  0xef   :  { %691 = vmatmul.mubr.msk.bf16.vlgmr.msra.gmra.mxu1 %vm280_vm1, %v737_v7 }
  0xf0   :  { %694 = vmatprep.mubr.msk.bf16.mxu1 %vm280_vm1, %v738_v8 }
  0xf7   :  { %695 = vmatmul.mubr.msk.bf16.gmra.mxu1 %vm280_vm1, %v739_v9 }
  0xf8   :  { %722 = vmatprep.mubr.msk.bf16.mxu1 %vm755_vm2, %v754_v50 }
 0x1af   :  { %v692_v12 = vpop.f32.mrf.mxu1 }
 0x1b0   :  { %v336_v32 = vadd.f32 %v692_v12, %v233_v26  ;;  %v394_v12 = vpop.permute.xlu1 %393 }
 0x1b1   :  { %v327_v14 = vpop.f32.mrf.mxu1 }
 0x1b2   :  { %v360_v41 = vmax.f32 %v336_v32, 0.0  ;;  %v328_v42 = vadd.f32 %v327_v14, %v223_v40 }
 0x1b3   :  { %v693_v15 = vpop.f32.mrf.mxu1 }
 0x1b4   :  { %v339_v28 = vadd.f32 %v693_v15, %v238_v22  ;;  %v358_v45 = vmax.f32 %v328_v42, 0.0 }
 0x1b5   :  { %v330_v17 = vpop.f32.mrf.mxu1 }
 0x1b6   :  { %v361_v37 = vmax.f32 %v339_v28, 0.0  ;;  %v331_v38 = vadd.f32 %v330_v17, %v228_v36 }
 0x1b7   :  { %v696_v19 = vpop.f32.mrf.mxu1 }
 0x1b8   :  { %v352_v21 = vadd.f32 %v696_v19, %v253_v13  ;;  %v375_v43 = vpack.c.bf16 %v361_v37, %v360_v41  ;;  %v359_v44 = vmax.f32 %v331_v38, 0.0 }
 0x1b9   :  { %v343_v20 = vpop.f32.mrf.mxu1 }
 0x1ba   :  { %v344_v24 = vadd.f32 %v343_v20, %v243_v18  ;;  %v364_v29 = vmax.f32 %v352_v21, 0.0  ;;  %v374_v46 = vpack.c.bf16 %v359_v44, %v358_v45 }
 0x1bb   :  { %v697_v23 = vpop.f32.mrf.mxu1 }
 0x1bc   :  { %v355_v25 = vadd.f32 %v697_v23, %v258_v11  ;;  %v362_v33 = vmax.f32 %v344_v24, 0.0  ;;  %v744_v23 = vld [vmem:[%s955_s7] sm:$0x3f]  }
 0x1bd   :  { %v346_v27 = vpop.f32.mrf.mxu1 }
 0x1be   :  { %v365_v30 = vmax.f32 %v355_v25, 0.0  ;;  %v347_v31 = vadd.f32 %v346_v27, %v248_v16  ;;  %v389_v16 = vpop.permute.xlu0 %388 }
 0x1c0   :  { %v377_v34 = vpack.c.bf16 %v365_v30, %v364_v29  ;;  %v363_v35 = vmax.f32 %v347_v31, 0.0  ;;  %v547_v29 = vpop.permute.xlu1 %546 }
 0x1c2   :  { %v376_v39 = vpack.c.bf16 %v363_v35, %v362_v33  ;;  %698 = vmatprep.subr.bf16.mxu0 %v377_v34  ;;  %v542_v24 = vpop.permute.xlu0 %541 }
 0x1c3   :  { %699 = vmatpush3.bf16.msra.mxu0 %v377_v34 }
 0x1c4   :  { %700 = vmatprep.subr.bf16.mxu0 %v376_v39 }
 0x1c7   :  { %701 = vmatpush3.bf16.msra.mxu0 %v376_v39 }
 0x1c8   :  { %702 = vmatprep.subr.bf16.mxu0 %v375_v43 }
 0x1cb   :  { %703 = vmatpush3.bf16.msra.mxu0 %v375_v43 }
 0x1cc   :  { %704 = vmatprep.subr.bf16.mxu0 %v374_v46 }
 0x1cf   :  { %705 = vmatpush3.bf16.msra.mxu0 %v374_v46 }
 0x1d2   :  { %707 = vmatmul.mubr.msk.bf16.vlgmr.msra.gmra.mxu0 %vm280_vm1, %v741_v47 }
 0x1d3   :  { %710 = vmatprep.mubr.msk.bf16.mxu0 %vm280_vm1, %v742_v48 }
 0x1da   :  { %711 = vmatmul.mubr.msk.bf16.gmra.mxu0 %vm280_vm1, %v743_v49 }
 0x292   :  { %v708_v51 = vpop.f32.mrf.mxu0 }
 0x293   :  { %v501_v10 = vadd.f32 %v708_v51, %v399_v6 }
 0x294   :  { %v492_v53 = vpop.f32.mrf.mxu0 }
 0x295   :  { %v525_v17 = vmax.f32 %v501_v10, 0.0  ;;  %v493_v18 = vadd.f32 %v492_v53, %v389_v16 }
 0x296   :  { %v709_v55 = vpop.f32.mrf.mxu0 }
 0x297   :  { %v504_v7 = vadd.f32 %v709_v55, %v404_v0  ;;  %v523_v21 = vmax.f32 %v493_v18, 0.0 }
 0x298   :  { %v495_v56 = vpop.f32.mrf.mxu0 }
 0x299   :  { %v526_v13 = vmax.f32 %v504_v7, 0.0  ;;  %v496_v14 = vadd.f32 %v495_v56, %v394_v12 }
 0x29a   :  { %v712_v58 = vpop.f32.mrf.mxu0 }
 0x29b   :  { %v517_v61 = vadd.f32 %v712_v58, %v419_v54  ;;  %v534_v19 = vpack.c.bf16 %v526_v13, %v525_v17  ;;  %v524_v20 = vmax.f32 %v496_v14, 0.0 }
 0x29c   :  { %v508_v60 = vpop.f32.mrf.mxu0 }
 0x29d   :  { %v529_v2 = vmax.f32 %v517_v61, 0.0  ;;  %v509_v3 = vadd.f32 %v508_v60, %v409_v59  ;;  %v533_v22 = vpack.c.bf16 %v524_v20, %v523_v21 }
 0x29e   :  { %v713_v62 = vpop.f32.mrf.mxu0 }
 0x29f   :  { %v520_v63 = vadd.f32 %v713_v62, %v424_v52  ;;  %v527_v11 = vmax.f32 %v509_v3, 0.0 }
 0x2a0   :  { %v511_v1 = vpop.f32.mrf.mxu0 }
 0x2a1   :  { %v530_v4 = vmax.f32 %v520_v63, 0.0  ;;  %v512_v5 = vadd.f32 %v511_v1, %v414_v57 }
 0x2a3   :  { %v536_v8 = vpack.c.bf16 %v530_v4, %v529_v2  ;;  %v528_v9 = vmax.f32 %v512_v5, 0.0 }
 0x2a5   :  { %715 = vmatpush3.bf16.msra.mxu1 %v536_v8  ;;  %v535_v15 = vpack.c.bf16 %v528_v9, %v527_v11 }
 0x2a6   :  { %716 = vmatprep.subr.bf16.mxu1 %v754_v50 }
 0x2a9   :  { %717 = vmatpush3.bf16.msra.mxu1 %v535_v15 }
 0x2aa   :  { %718 = vmatprep.subr.bf16.mxu1 %v754_v50 }
 0x2ad   :  { %719 = vmatpush3.bf16.msra.mxu1 %v534_v19 }
 0x2ae   :  { %720 = vmatprep.subr.bf16.mxu1 %v754_v50 }
 0x2b1   :  { %721 = vmatpush3.bf16.msra.mxu1 %v533_v22 }
 0x2b4   :  { %723 = vmatmul.mubr.msk.bf16.vlgmr.msra.gmra.mxu1 %vm280_vm1, %v744_v23 }
 0x374   :  { %v591_v25 = vpop.f32.mrf.mxu1 }
 0x375   :  { %v592_v26 = vadd.f32 %v591_v25, %v542_v24 }
 0x376   :  { %v724_v27 = vpop.f32.mrf.mxu1 }
 0x377   :  { %v644_v28 = vmul.f32 -1.442695, %v592_v26 }
 0x378   :  { %v594_v30 = vpop.f32.mrf.mxu1 }
 0x379   :  { %745 = vpow2.f32 %v644_v28  ;;  %v595_v31 = vadd.f32 %v594_v30, %v547_v29 }
 0x37a   :  { %v725_v32 = vpop.f32.mrf.mxu1 }
 0x37b   :  { %v645_v33 = vmul.f32 -1.442695, %v595_v31 }
 0x37d   :  { %747 = vpow2.f32 %v645_v33 }
 0x386   :  { %v746_v34 = vpop.eup %745 }
 0x387   :  { %v604_v35 = vadd.f32 1.0, %v746_v34 }
 0x389   :  { %749 = vrcp.f32 %v604_v35 }
 0x38a   :  { %v748_v36 = vpop.eup %747 }
 0x38b   :  { %v605_v37 = vadd.f32 1.0, %v748_v36 }
 0x38d   :  { %751 = vrcp.f32 %v605_v37 }
 0x396   :  { %v750_v38 = vpop.eup %749 }
 0x397   :  { %611 = vst.msk [vmem:[%s956_s9] sm:$0xff] %vm610_vm3, %v750_v38 }
 0x39a   :  { %v752_v39 = vpop.eup %751 }
 0x39b   :  { %613 = vst.msk [vmem:[%s956_s9 + $0x8] sm:$0xf] %vm612_vm4, %v752_v39 }

</bundles_post_ra>
